<compile_context>
chip_gen: v7x
topology: tpu7x:2x2x1
jax: 0.10.0
libtpu: 0.0.40
codegen_flags: <defaults>
</compile_context>

<pallas_src>
import functools

import jax
import jax.numpy as jnp
from jax.experimental import pallas as pl
from jax.experimental.pallas import tpu as pltpu

_LANE = 128
_TARGET_TILE_BYTES = 2 * 1024 * 1024  # per-input, per-pipeline-buffer tile


def _round_up(x: int, m: int) -> int:
    return ((x + m - 1) // m) * m


def _l2_sum_kernel(p_ref, t_ref, out_ref, *, valid_in_last, needs_mask):
    """Accumulate per-lane partial sums of (p - t)^2 into the (8,128) output."""
    step = pl.program_id(0)
    last = pl.num_programs(0) - 1

    @pl.when(step == 0)
    def _init():
        out_ref[...] = jnp.zeros_like(out_ref)

    d = p_ref[...].astype(jnp.float32) - t_ref[...].astype(jnp.float32)
    sq = d * d  # (block_rows, 128)

    if needs_mask:
        # Only the last block contains out-of-bounds (garbage) elements;
        # pay the iota/compare/select cost on that single step only.
        @pl.when(step != last)
        def _body():
            out_ref[...] += jnp.sum(sq.reshape(-1, 8, _LANE), axis=0)

        @pl.when(step == last)
        def _tail():
            row = jax.lax.broadcasted_iota(jnp.int32, sq.shape, 0)
            lane = jax.lax.broadcasted_iota(jnp.int32, sq.shape, 1)
            lidx = row * _LANE + lane  # element index within this block
            sq_m = jnp.where(lidx < valid_in_last, sq, 0.0)
            out_ref[...] += jnp.sum(sq_m.reshape(-1, 8, _LANE), axis=0)
    else:
        out_ref[...] += jnp.sum(sq.reshape(-1, 8, _LANE), axis=0)


def l2_loss(predictions: jax.Array, targets: jax.Array) -> jax.Array:
    """MSELoss(predictions, targets): mean of (predictions - targets)^2."""
    assert predictions.shape == targets.shape, "shape mismatch"
    n = predictions.size
    assert n > 0, "empty input"

    p = predictions.reshape(-1)
    t = targets.reshape(-1)

    rows = -(-n // _LANE)  # ceil(n / 128)
    n_lane = rows * _LANE
    if n_lane != n:
        # TODO(synk): residual copy; only taken when numel % 128 != 0.
        p = jnp.pad(p, (0, n_lane - n))
        t = jnp.pad(t, (0, n_lane - n))
    p2 = p.reshape(rows, _LANE)
    t2 = t.reshape(rows, _LANE)

    # Sublane multiple depends on the narrowest streamed dtype
    # (8 for f32, 16 for bf16/f16, 32 for int8/fp8).
    min_item = min(jnp.dtype(p2.dtype).itemsize, jnp.dtype(t2.dtype).itemsize)
    max_item = max(jnp.dtype(p2.dtype).itemsize, jnp.dtype(t2.dtype).itemsize)
    sub_mult = max(8, 32 // max(min_item, 1))

    max_block_rows = max(
        sub_mult,
        (_TARGET_TILE_BYTES // (_LANE * max_item)) // sub_mult * sub_mult,
    )
    block_rows = min(max_block_rows, _round_up(rows, sub_mult))
    num_blocks = -(-rows // block_rows)

    covered = num_blocks * block_rows * _LANE
    needs_mask = covered > n_lane
    valid_in_last = n - (num_blocks - 1) * block_rows * _LANE

    kernel = functools.partial(
        _l2_sum_kernel,
        valid_in_last=valid_in_last,
        needs_mask=needs_mask,
    )

    partials = pl.pallas_call(
        kernel,
        out_shape=jax.ShapeDtypeStruct((8, _LANE), jnp.float32),
        grid_spec=pltpu.PrefetchScalarGridSpec(
            num_scalar_prefetch=0,
            grid=(num_blocks,),
            in_specs=[
                pl.BlockSpec((block_rows, _LANE), lambda i: (i, 0)),
                pl.BlockSpec((block_rows, _LANE), lambda i: (i, 0)),
            ],
            out_specs=pl.BlockSpec((8, _LANE), lambda i: (0, 0)),
        ),
        compiler_params=pltpu.CompilerParams(
            dimension_semantics=("arbitrary",),  # reduction axis
            vmem_limit_bytes=32 * 1024 * 1024,
        ),
    )(p2, t2)

    out_dtype = jnp.promote_types(predictions.dtype, targets.dtype)
    if not jnp.issubdtype(out_dtype, jnp.floating):
        out_dtype = jnp.float32
    return (jnp.sum(partials) / jnp.float32(n)).astype(out_dtype)


if __name__ == "__main__":
    # Primary case: small NCHW-shaped inputs (batch=2, channels=4, 16x16).
    kp, kt = jax.random.split(jax.random.PRNGKey(0))
    predictions = jax.random.normal(kp, (2, 4, 16, 16), dtype=jnp.float32)
    targets = jax.random.normal(kt, (2, 4, 16, 16), dtype=jnp.float32)

    loss = jax.block_until_ready(l2_loss(predictions, targets))
    ref = jax.block_until_ready(jnp.mean((predictions - targets) ** 2))
    assert loss.shape == ()
    assert loss.dtype == jnp.float32
    assert abs(float(loss) - float(ref)) <= 1e-6 * max(1.0, abs(float(ref))), (
        float(loss), float(ref))

    # Ragged case: rows not a multiple of the block height, numel % 128 == 0
    # -> exercises the in-kernel tail mask with NO wrapper-side padding.
    kp2, kt2 = jax.random.split(jax.random.PRNGKey(1))
    p_r = jax.random.normal(kp2, (2, 13, 64), dtype=jnp.float32)
    t_r = jax.random.normal(kt2, (2, 13, 64), dtype=jnp.float32)
    loss_r = jax.block_until_ready(l2_loss(p_r, t_r))
    ref_r = jax.block_until_ready(jnp.mean((p_r - t_r) ** 2))
    assert abs(float(loss_r) - float(ref_r)) <= 1e-6 * max(1.0, abs(float(ref_r))), (
        float(loss_r), float(ref_r))

    # Unaligned case: numel % 128 != 0 -> lane-pad fallback + in-kernel mask.
    kp3, kt3 = jax.random.split(jax.random.PRNGKey(2))
    p_u = jax.random.normal(kp3, (3, 5, 7), dtype=jnp.float32)
    t_u = jax.random.normal(kt3, (3, 5, 7), dtype=jnp.float32)
    loss_u = jax.block_until_ready(l2_loss(p_u, t_u))
    ref_u = jax.block_until_ready(jnp.mean((p_u - t_u) ** 2))
    assert abs(float(loss_u) - float(ref_u)) <= 1e-6 * max(1.0, abs(float(ref_u))), (
        float(loss_u), float(ref_u))

    print("KERNEL_OK")
</pallas_src>

<mosaic_0001>
module attributes {stable_mosaic.version = 11 : i64} {
  func.func @_l2_sum_kernel(%arg0: i32, %arg1: memref<16x128xf32, #tpu.memory_space<vmem>>, %arg2: memref<16x128xf32, #tpu.memory_space<vmem>>, %arg3: memref<8x128xf32, #tpu.memory_space<vmem>>) attributes {dimension_semantics = [#tpu.dimension_semantics<arbitrary>], iteration_bounds = array<i64: 1>, scalar_prefetch = 0 : i64, scratch_operands = 0 : i64, tpu.core_type = #tpu.core_type<tc>, window_params = [{transform_indices = @transform_0, window_bounds = array<i64: 16, 128>}, {transform_indices = @transform_1, window_bounds = array<i64: 16, 128>}, {pipeline_mode = #tpu.pipeline_mode<synchronous>, transform_indices = @transform_2, window_bounds = array<i64: 8, 128>}]} {
    %c0_i32 = arith.constant 0 : i32
    %0 = arith.cmpi eq, %arg0, %c0_i32 : i32
    %1 = arith.extui %0 : i1 to i32
    %c0_i32_0 = arith.constant 0 : i32
    %2 = arith.cmpi ne, %1, %c0_i32_0 : i32
    scf.if %2 {
      %cst_8 = arith.constant 0.000000e+00 : f32
      %12 = vector.broadcast %cst_8 : f32 to vector<8x128xf32>
      %c0_9 = arith.constant 0 : index
      %c0_10 = arith.constant 0 : index
      %13 = vector.load %arg3[%c0_9, %c0_10] : memref<8x128xf32, #tpu.memory_space<vmem>>, vector<8x128xf32>
      tpu.vector_store %arg3[%c0_9, %c0_10], %12 {strides = array<i32>} : memref<8x128xf32, #tpu.memory_space<vmem>>, vector<8x128xf32>,
    } else {
    }
    %c0 = arith.constant 0 : index
    %c0_1 = arith.constant 0 : index
    %3 = vector.load %arg1[%c0, %c0_1] : memref<16x128xf32, #tpu.memory_space<vmem>>, vector<16x128xf32>
    %c0_2 = arith.constant 0 : index
    %c0_3 = arith.constant 0 : index
    %4 = vector.load %arg2[%c0_2, %c0_3] : memref<16x128xf32, #tpu.memory_space<vmem>>, vector<16x128xf32>
    %5 = arith.subf %3, %4 : vector<16x128xf32>
    %6 = arith.mulf %5, %5 : vector<16x128xf32>
    %c0_4 = arith.constant 0 : index
    %c0_5 = arith.constant 0 : index
    %7 = vector.load %arg3[%c0_4, %c0_5] : memref<8x128xf32, #tpu.memory_space<vmem>>, vector<8x128xf32>
    %8 = vector.shape_cast %6 : vector<16x128xf32> to vector<2x8x128xf32>
    %cst = arith.constant dense<0.000000e+00> : vector<8x128xf32>
    %9 = vector.multi_reduction <add>, %8, %cst [0] : vector<2x8x128xf32> to vector<8x128xf32>
    %10 = arith.addf %7, %9 : vector<8x128xf32>
    %c0_6 = arith.constant 0 : index
    %c0_7 = arith.constant 0 : index
    %11 = vector.load %arg3[%c0_6, %c0_7] : memref<8x128xf32, #tpu.memory_space<vmem>>, vector<8x128xf32>
    tpu.vector_store %arg3[%c0_6, %c0_7], %10 {strides = array<i32>} : memref<8x128xf32, #tpu.memory_space<vmem>>, vector<8x128xf32>,
    return
  }
  func.func @transform_0(%arg0: i32) -> (i32, i32) {
    %c0_i32 = arith.constant 0 : i32
    %c0_i32_0 = arith.constant 0 : i32
    return %arg0, %c0_i32 : i32, i32
  }
  func.func @transform_1(%arg0: i32) -> (i32, i32) {
    %c0_i32 = arith.constant 0 : i32
    %c0_i32_0 = arith.constant 0 : i32
    return %arg0, %c0_i32 : i32, i32
  }
  func.func @transform_2(%arg0: i32) -> (i32, i32) {
    %c0_i32 = arith.constant 0 : i32
    %c0_i32_0 = arith.constant 0 : i32
    %c0_i32_1 = arith.constant 0 : i32
    return %c0_i32, %c0_i32_0 : i32, i32
  }
}

</mosaic_0001>

<bundles_post_ra>
// kernel: tpu_custom_call.1
= control target key start
LH: loop header
LB: loop body
LE: loop exit
PB: predicated region body
PF: predicated region fallthrough
CT: control target
= control target key end

     0   :  { %7 = vsyncpa [#allocation3], 0  ;;  %s207_s0 = inlined_call_operand.hbm [shape: f32[16,128], index: 0, kind: input, shape index: {}]   ;;  %s208_s1 = inlined_call_operand.hbm [shape: f32[16,128], index: 1, kind: input, shape index: {}]   ;;  %s209_s2 = inlined_call_operand.hbm [shape: f32[8,128], index: 2, kind: output, shape index: {}]  }
   0x1   :  { %8 = vsyncpa [#allocation6], 0 }
   0x2   :  { %9 = vsyncpa [#allocation4], 0  ;;  %s151_s9 = smov [#allocation2]   ;;  %s79_s13 = scalar_lea.hbm %s207_s0, 256 }
   0x3   :  { %s15_s10 = sshll.u32 %s151_s9, 4  ;;  %p80_p0 = scmp.ne.s32.totalorder %s207_s0, %s79_s13  ;;  %s16_s10 = int_to_ptr.vmem [resolvable:$true] %s15_s10 }
   0x4   :  { %p83_p1 = scmp.lt.u32.totalorder %s79_s13, %s207_s0 }
   0x6   :  { %p85_p2 = pnand %p83_p1, %p80_p0 }
   0x8   :  { %88 = shalt.err (!%p85_p2)
}
   0x9   :  { %s89_s18 = scalar_lea.vmem %s16_s10, 256  ;;  %p94_p4 = scmp.lt.s32.totalorder %s16_s10, %s16_s10 }
   0xa   :  { %p90_p3 = scmp.ne.s32.totalorder %s16_s10, %s89_s18  ;;  %p95_p5 = scmp.lt.s32.totalorder %s89_s18, %s89_s18 }
   0xc   :  { %p96_p6 = por %p95_p5, %p94_p4 }
   0xe   :  { %p97_p7 = pnand %p96_p6, %p90_p3 }
  0x10   :  { %100 = shalt.err (!%p97_p7)
}
  0x11   :  { %s152_s19 = smov 128   ;;  %s153_s20 = smov 8  }
  0x12   :  { %21 = dma.hbm_to_vmem [thread:$0]  %s207_s0, 256, %s16_s10, [#allocation3], %s152_s19, %s152_s19, %s153_s20  }
  0x13   :  { %s154_s23 = smov [#allocation5]   ;;  %s101_s27 = scalar_lea.hbm %s208_s1, 256 }
  0x14   :  { %s27_s24 = sshll.u32 %s154_s23, 4  ;;  %p102_p8 = scmp.ne.s32.totalorder %s208_s1, %s101_s27  ;;  %s28_s24 = int_to_ptr.vmem [resolvable:$true] %s27_s24 }
  0x15   :  { %p105_p9 = scmp.lt.u32.totalorder %s101_s27, %s208_s1 }
  0x17   :  { %p107_p10 = pnand %p105_p9, %p102_p8 }
  0x19   :  { %110 = shalt.err (!%p107_p10)
}
  0x1a   :  { %s111_s4 = scalar_lea.vmem %s28_s24, 256  ;;  %p116_p12 = scmp.lt.s32.totalorder %s28_s24, %s28_s24 }
  0x1b   :  { %p112_p11 = scmp.ne.s32.totalorder %s28_s24, %s111_s4  ;;  %p117_p13 = scmp.lt.s32.totalorder %s111_s4, %s111_s4 }
  0x1d   :  { %p118_p0 = por %p117_p13, %p116_p12 }
  0x1f   :  { %p119_p1 = pnand %p118_p0, %p112_p11 }
  0x21   :  { %122 = shalt.err (!%p119_p1)
}
  0x22   :  { %33 = dma.hbm_to_vmem [thread:$0]  %s208_s1, 256, %s28_s24, [#allocation6], %s152_s19, %s152_s19, %s153_s20  }
  0x23   :  { %145 = dma.done.wait [#allocation3], 256  }
  0x24   :  { %146 = vsyncadd [#allocation3], 4294967040 }
  0x25   :  { %147 = dma.done.wait [#allocation6], 256  }
  0x26   :  { %148 = vsyncadd [#allocation6], 4294967040  ;;  %v45_v0 = vld [vmem:[#allocation2] sm:$0xff]  ;;  %v46_v1 = vld [vmem:[#allocation2 + $0x8] sm:$0xff]  ;;  %s155_s6 = smov [#allocation7]  }
  0x27   :  { %v47_v2 = vld [vmem:[#allocation5] sm:$0xff]  ;;  %v48_v3 = vld [vmem:[#allocation5 + $0x8] sm:$0xff]  ;;  %s63_s7 = sshll.u32 %s155_s6, 4  ;;  %s64_s7 = int_to_ptr.vmem [resolvable:$true] %s63_s7 }
  0x28   :  { %v49_v4 = vsub.f32 %v45_v0, %v47_v2  ;;  %v50_v5 = vsub.f32 %v46_v1, %v48_v3  ;;  %s123_s8 = scalar_lea.vmem %s64_s7, 128  ;;  %p128_p3 = scmp.lt.s32.totalorder %s64_s7, %s64_s7 }
  0x29   :  { %p124_p2 = scmp.ne.s32.totalorder %s64_s7, %s123_s8  ;;  %p129_p4 = scmp.lt.s32.totalorder %s123_s8, %s123_s8 }
  0x2a   :  { %v51_v6 = vmul.f32 %v49_v4, %v49_v4  ;;  %v52_v7 = vmul.f32 %v50_v5, %v50_v5 }
  0x2b   :  { %p130_p5 = por %p129_p4, %p128_p3 }
  0x2c   :  { %v54_v8 = vadd.f32 %v52_v7, %v51_v6 }
  0x2d   :  { %p131_p6 = pnand %p130_p5, %p124_p2 }
  0x2e   :  { %56 = vst [vmem:[#allocation7] sm:$0xff] %v54_v8 }
  0x2f   :  { %134 = shalt.err (!%p131_p6)
}
  0x30   :  { %s135_s10 = scalar_lea.hbm %s209_s2, 128 }
  0x31   :  { %p136_p7 = scmp.ne.s32.totalorder %s209_s2, %s135_s10  ;;  %p139_p8 = scmp.lt.u32.totalorder %s135_s10, %s209_s2 }
  0x33   :  { %p141_p9 = pnand %p139_p8, %p136_p7 }
  0x35   :  { %144 = shalt.err (!%p141_p9)
}
  0x36   :  { %66 = dma.vmem_to_hbm [thread:$0]  %s64_s7, 128, %s209_s2, [#allocation4]  }
  0x37   :  { %149 = dma.done.wait [#allocation4], 128  }
  0x38   :  { %150 = vsyncadd [#allocation4], 4294967168 }
  0x39   :  { %70 = vsyncpa [#allocation3], 1 }
  0x3a   :  { %71 = vsyncpa [#allocation6], 1 }
  0x3b   :  { %72 = vsyncpa [#allocation4], 1 }

</bundles_post_ra>
